<compile_context>
chip_gen: v7x
topology: tpu7x:2x2x1
jax: 0.10.0
libtpu: 0.0.40
codegen_flags: <defaults>
</compile_context>

<pallas_src>
import functools

import jax
import jax.numpy as jnp
from jax.experimental import pallas as pl
from jax.experimental.pallas import tpu as pltpu

FILTER_SIZES = (3, 4, 5)
NBLK = len(FILTER_SIZES)
K_MAX = max(FILTER_SIZES)
FEATURES = 100            # per-filter conv channels in the PyTorch module
FPAD = 128                # features padded to a full lane width
NUM_CLASSES = 8
MAX_TB = 128              # max batch tile (rows of the FC matmul / sublane-aligned)


def textcnn_kernel(valid_t, win_ref, wconv_ref, bconv_ref, wf_ref, bf_ref, out_ref):
    """Fused conv(all 3 filter sizes, one MXU matmul) + bias/ReLU + masked max-pool + FC.

    win_ref   : (TB*T_win, K_MAX*D) bf16  shared k=5 im2col windows, batch folded into M
    wconv_ref : (K_MAX*D, 3*FPAD)   bf16  per-filter weights, zero-padded to 5 taps / 128 lanes
    bconv_ref : (1, 3*FPAD)         f32
    wf_ref    : (3*FPAD, FPAD)      bf16  fc weight, rows/cols zero-padded
    bf_ref    : (1, FPAD)           f32
    out_ref   : (TB, FPAD)          f32   lane-dense output (cols >= 8 sliced off outside)
    """
    tb = out_ref.shape[0]
    m = win_ref.shape[0]
    t_win = m // tb

    # One lane-dense MXU matmul does all three convolutions (bf16 operands, f32 accumulation).
    y = jnp.dot(win_ref[...], wconv_ref[...], preferred_element_type=jnp.float32)  # (m, 3*FPAD)
    y = jnp.maximum(y + bconv_ref[...], 0.0)                                        # bias + ReLU

    # Window position t >= valid_t[ki] is a padding-only window for filter ki.
    # NOTE: masking those to 0 before the max is only valid because the activation is ReLU
    # (outputs >= 0); revisit if the activation ever changes.
    # The mask is a tiny (t_win, 3*FPAD) compile-time tensor, broadcast over the batch dim.
    t_idx = jax.lax.broadcasted_iota(jnp.int32, (t_win, NBLK * FPAD), 0)
    valid_row = jnp.concatenate(
        [jnp.full((1, FPAD), v, jnp.int32) for v in valid_t], axis=1)               # (1, 3*FPAD)
    mask = t_idx < valid_row                                                         # (t_win, 3*FPAD)

    # Vectorized max-pool over time for all filters and all batch rows at once; kept as a value
    # (no VMEM scratch, no sub-sublane masked stores).
    yb = jnp.where(mask[None, :, :], y.reshape(tb, t_win, NBLK * FPAD), 0.0)
    pooled = jnp.max(yb, axis=1)                                                     # (tb, 3*FPAD)

    # Dropout is identity at inference.  Final FC over the (already concatenated, padded) pooled
    # features as ONE lane-dense matmul; zero-padded rows/lanes contribute exactly 0.
    out_ref[...] = (jnp.dot(pooled.astype(jnp.bfloat16), wf_ref[...],
                            preferred_element_type=jnp.float32) + bf_ref[...])


def init_params(key, vocab_size, input_size):
    ks = jax.random.split(key, 9)
    params = {
        # nn.Embedding(len(vocab), input_size) (vocab.vectors replaced by random init)
        'embedding': jax.random.normal(ks[0], (vocab_size, input_size), jnp.float32),
        'conv_w': [],   # flattened Conv2d weights: (k*D, F), row order = (tap, embed_dim)
        'conv_b': [],   # Conv2d biases: (1, F)
        # nn.Linear(3*F, 8) stored as (3F, 8) so forward is x @ W + b
        'fc_w': 0.05 * jax.random.normal(ks[1], (3 * FEATURES, NUM_CLASSES), jnp.float32),
        'fc_b': 0.05 * jax.random.normal(ks[2], (1, NUM_CLASSES), jnp.float32),
    }
    for idx, k in enumerate(FILTER_SIZES):
        params['conv_w'].append(
            0.1 * jax.random.normal(ks[3 + idx], (k * input_size, FEATURES), jnp.float32))
        params['conv_b'].append(
            0.1 * jax.random.normal(ks[6 + idx], (1, FEATURES), jnp.float32))
    return params


def _pack_params(params, input_size):
    d = input_size
    # Conv weights -> one (K_MAX*D, 3*FPAD) matrix.  Column block ki holds filter ki, zero-padded
    # to K_MAX taps (rows) and FPAD features (lanes); padded entries are 0 so they never change
    # the conv value / ReLU / max / FC sum.
    wcols, bcols = [], []
    for idx, k in enumerate(FILTER_SIZES):
        w = jnp.pad(params['conv_w'][idx],
                    ((0, (K_MAX - k) * d), (0, FPAD - FEATURES)))
        wcols.append(w)
        bcols.append(jnp.pad(params['conv_b'][idx], ((0, 0), (0, FPAD - FEATURES))))
    w_conv = jnp.concatenate(wcols, axis=1).astype(jnp.bfloat16)      # (K_MAX*D, 3*FPAD)
    b_conv = jnp.concatenate(bcols, axis=1).astype(jnp.float32)       # (1, 3*FPAD)

    # FC weight re-blocked to match the padded pooled-feature layout; lanes padded 8 -> 128.
    fblocks = []
    for idx in range(len(FILTER_SIZES)):
        blk = params['fc_w'][idx * FEATURES:(idx + 1) * FEATURES, :]  # (100, 8)
        fblocks.append(jnp.pad(blk, ((0, FPAD - FEATURES), (0, FPAD - NUM_CLASSES))))
    w_fc = jnp.concatenate(fblocks, axis=0).astype(jnp.bfloat16)      # (3*FPAD, FPAD)
    b_fc = jnp.pad(params['fc_b'], ((0, 0), (0, FPAD - NUM_CLASSES))).astype(jnp.float32)
    return w_conv, b_conv, w_fc, b_fc


def _choose_batch_tile(batch):
    """Sublane-aligned batch tile <= MAX_TB; >=2 grid steps when the batch allows (v7x 2 TCs)."""
    b8 = pl.cdiv(batch, 8) * 8
    tb = min(MAX_TB, b8)
    if b8 > 8 and b8 // tb < 2:
        tb = pl.cdiv(b8, 2 * 8) * 8
    b_pad = pl.cdiv(b8, tb) * tb
    return tb, b_pad


def cnn_forward(tokens, params):
    # Embedding lookup: glue in plain JAX (gather).
    # TODO(synk): fuse the embedding gather via scalar-prefetch / DMA gather inside the kernel.
    # Cast to bf16 BEFORE the im2col so the 5x-expanded window tensor is materialized in bf16.
    emb = jnp.take(params['embedding'], tokens, axis=0).astype(jnp.bfloat16)   # (B, L, D)
    B, L, D = emb.shape
    assert L >= K_MAX

    # Single shared im2col at the largest filter size over a zero-padded sequence, so that every
    # valid position of every filter size is covered by exactly one window row.
    t_win = pl.cdiv(L - min(FILTER_SIZES) + 1, 8) * 8                 # pooled-time extent, 8-aligned
    tb, b_pad = _choose_batch_tile(B)
    seq_pad = t_win + K_MAX - 1 - L
    emb = jnp.pad(emb, ((0, b_pad - B), (0, seq_pad), (0, 0)))
    win = jnp.stack([emb[:, j:j + t_win, :] for j in range(K_MAX)], axis=2)    # (Bp, Tw, K_MAX, D)
    win = win.reshape(b_pad * t_win, K_MAX * D)                                # bf16, batch in M

    w_conv, b_conv, w_fc, b_fc = _pack_params(params, D)
    valid_t = tuple(L - k + 1 for k in FILTER_SIZES)                  # static per-filter pool extents
    kd = K_MAX * D

    out = pl.pallas_call(
        functools.partial(textcnn_kernel, valid_t),
        out_shape=jax.ShapeDtypeStruct((b_pad, FPAD), jnp.float32),
        grid=(b_pad // tb,),
        in_specs=[
            pl.BlockSpec((tb * t_win, kd), lambda i: (i, 0)),         # windows: tiled over batch
            pl.BlockSpec((kd, NBLK * FPAD), lambda i: (0, 0)),        # weights stay resident
            pl.BlockSpec((1, NBLK * FPAD), lambda i: (0, 0)),
            pl.BlockSpec((NBLK * FPAD, FPAD), lambda i: (0, 0)),
            pl.BlockSpec((1, FPAD), lambda i: (0, 0)),
        ],
        out_specs=pl.BlockSpec((tb, FPAD), lambda i: (i, 0)),         # lane-dense (tb, 128) store
        compiler_params=pltpu.CompilerParams(
            dimension_semantics=("parallel",)),                       # megacore-shard batch (v7x)
    )(win, w_conv, b_conv, w_fc, b_fc)

    return out[:B, :NUM_CLASSES]


def cnn_forward_ref(tokens, params):
    """Pure-JAX reference (operands bf16-rounded to mirror the kernel's MXU inputs)."""
    bf16 = lambda x: x.astype(jnp.bfloat16).astype(jnp.float32)
    hi = jax.lax.Precision.HIGHEST
    emb = bf16(jnp.take(params['embedding'], tokens, axis=0))
    B, L, _ = emb.shape
    feats = []
    for idx, k in enumerate(FILTER_SIZES):
        T = L - k + 1
        w = jnp.stack([emb[:, j:j + T, :] for j in range(k)], axis=2).reshape(B, T, -1)
        s = jnp.einsum('btk,kf->btf', w, bf16(params['conv_w'][idx]), precision=hi)
        s = jnp.maximum(s + params['conv_b'][idx], 0.0)
        feats.append(jnp.max(s, axis=1))
    feat = bf16(jnp.concatenate(feats, axis=-1))
    return jnp.dot(feat, bf16(params['fc_w']), precision=hi) + params['fc_b']


if __name__ == "__main__":
    key = jax.random.PRNGKey(0)
    k_tok, k_par = jax.random.split(key)

    VOCAB = 50
    INPUT_SIZE = 32     # embedding dim D
    FIX_LENGTH = 16     # sequence length L
    BATCH = 2

    params = init_params(k_par, VOCAB, INPUT_SIZE)
    tokens = jax.random.randint(k_tok, (BATCH, FIX_LENGTH), 0, VOCAB, dtype=jnp.int32)

    out = jax.block_until_ready(cnn_forward(tokens, params))
    ref = jax.block_until_ready(cnn_forward_ref(tokens, params))

    assert out.shape == (BATCH, NUM_CLASSES)
    # Kernel uses bf16 MXU operands with f32 accumulation; reference uses the same bf16-rounded
    # operands in f32 math, so residual differences are accumulation-order / rounding noise.
    assert jnp.allclose(out, ref, atol=1e-2, rtol=1e-2), float(jnp.max(jnp.abs(out - ref)))
    print("KERNEL_OK")
</pallas_src>

<mosaic_0001>
module attributes {stable_mosaic.version = 11 : i64} {
  func.func @textcnn_kernel(%arg0: i32, %arg1: memref<128x160xbf16, #tpu.memory_space<vmem>>, %arg2: memref<160x384xbf16, #tpu.memory_space<vmem>>, %arg3: memref<1x384xf32, #tpu.memory_space<vmem>>, %arg4: memref<384x128xbf16, #tpu.memory_space<vmem>>, %arg5: memref<1x128xf32, #tpu.memory_space<vmem>>, %arg6: memref<8x128xf32, #tpu.memory_space<vmem>>) attributes {dimension_semantics = [#tpu.dimension_semantics<parallel>], iteration_bounds = array<i64: 1>, scalar_prefetch = 0 : i64, scratch_operands = 0 : i64, tpu.core_type = #tpu.core_type<tc>, window_params = [{transform_indices = @transform_0, window_bounds = array<i64: 128, 160>}, {pipeline_mode = #tpu.pipeline_mode<synchronous>, transform_indices = @transform_1, window_bounds = array<i64: 160, 384>}, {pipeline_mode = #tpu.pipeline_mode<synchronous>, transform_indices = @transform_2, window_bounds = array<i64: 1, 384>}, {pipeline_mode = #tpu.pipeline_mode<synchronous>, transform_indices = @transform_3, window_bounds = array<i64: 384, 128>}, {pipeline_mode = #tpu.pipeline_mode<synchronous>, transform_indices = @transform_4, window_bounds = array<i64: 1, 128>}, {transform_indices = @transform_5, window_bounds = array<i64: 8, 128>}]} {
    %c0 = arith.constant 0 : index
    %c0_0 = arith.constant 0 : index
    %0 = vector.load %arg1[%c0, %c0_0] : memref<128x160xbf16, #tpu.memory_space<vmem>>, vector<128x160xbf16>
    %c0_1 = arith.constant 0 : index
    %c0_2 = arith.constant 0 : index
    %1 = vector.load %arg2[%c0_1, %c0_2] : memref<160x384xbf16, #tpu.memory_space<vmem>>, vector<160x384xbf16>
    %cst = arith.constant dense<0.000000e+00> : vector<128x384xf32>
    %2 = tpu.matmul %0, %1, %cst {dimension_numbers = #tpu.dot_dimension_numbers<[1], [0], [0], [1], [0, 0, 1, 1], [], []>} : vector<128x160xbf16>, vector<160x384xbf16>, vector<128x384xf32> -> vector<128x384xf32>
    %c0_3 = arith.constant 0 : index
    %c0_4 = arith.constant 0 : index
    %3 = vector.load %arg3[%c0_3, %c0_4] : memref<1x384xf32, #tpu.memory_space<vmem>>, vector<1x384xf32>
    %4 = vector.broadcast %3 : vector<1x384xf32> to vector<128x384xf32>
    %5 = arith.addf %2, %4 : vector<128x384xf32>
    %cst_5 = arith.constant 0.000000e+00 : f32
    %6 = vector.broadcast %cst_5 : f32 to vector<128x384xf32>
    %7 = arith.maximumf %5, %6 : vector<128x384xf32>
    %8 = tpu.iota {dimensions = array<i32: 0>} : vector<16x384xi32>
    %c14_i32 = arith.constant 14 : i32
    %9 = vector.broadcast %c14_i32 : i32 to vector<1x128xi32>
    %c13_i32 = arith.constant 13 : i32
    %10 = vector.broadcast %c13_i32 : i32 to vector<1x128xi32>
    %c12_i32 = arith.constant 12 : i32
    %11 = vector.broadcast %c12_i32 : i32 to vector<1x128xi32>
    %12 = tpu.concatenate %9, %10, %11 in 1 : vector<1x128xi32>, vector<1x128xi32>, vector<1x128xi32> -> vector<1x384xi32>
    %13 = vector.broadcast %12 : vector<1x384xi32> to vector<16x384xi32>
    %14 = arith.cmpi slt, %8, %13 : vector<16x384xi32>
    %15 = vector.shape_cast %14 : vector<16x384xi1> to vector<1x16x384xi1>
    %16 = vector.shape_cast %7 : vector<128x384xf32> to vector<8x16x384xf32>
    %cst_6 = arith.constant 0.000000e+00 : f32
    %17 = vector.shape_cast %15 : vector<1x16x384xi1> to vector<1x16x384xi1>
    %18 = vector.broadcast %17 : vector<1x16x384xi1> to vector<8x16x384xi1>
    %19 = vector.broadcast %cst_6 : f32 to vector<8x16x384xf32>
    %20 = arith.select %18, %16, %19 : vector<8x16x384xi1>, vector<8x16x384xf32>
    %cst_7 = arith.constant dense<0xFF800000> : vector<8x384xf32>
    %21 = vector.multi_reduction <maximumf>, %20, %cst_7 [1] : vector<8x16x384xf32> to vector<8x384xf32>
    %22 = arith.truncf %21 : vector<8x384xf32> to vector<8x384xbf16>
    %c0_8 = arith.constant 0 : index
    %c0_9 = arith.constant 0 : index
    %23 = vector.load %arg4[%c0_8, %c0_9] : memref<384x128xbf16, #tpu.memory_space<vmem>>, vector<384x128xbf16>
    %cst_10 = arith.constant dense<0.000000e+00> : vector<8x128xf32>
    %24 = tpu.matmul %22, %23, %cst_10 {dimension_numbers = #tpu.dot_dimension_numbers<[1], [0], [0], [1], [0, 0, 1, 1], [], []>} : vector<8x384xbf16>, vector<384x128xbf16>, vector<8x128xf32> -> vector<8x128xf32>
    %c0_11 = arith.constant 0 : index
    %c0_12 = arith.constant 0 : index
    %25 = vector.load %arg5[%c0_11, %c0_12] : memref<1x128xf32, #tpu.memory_space<vmem>>, vector<1x128xf32>
    %26 = vector.broadcast %25 : vector<1x128xf32> to vector<8x128xf32>
    %27 = arith.addf %24, %26 : vector<8x128xf32>
    %c0_13 = arith.constant 0 : index
    %c0_14 = arith.constant 0 : index
    %28 = vector.load %arg6[%c0_13, %c0_14] : memref<8x128xf32, #tpu.memory_space<vmem>>, vector<8x128xf32>
    tpu.vector_store %arg6[%c0_13, %c0_14], %27 {strides = array<i32>} : memref<8x128xf32, #tpu.memory_space<vmem>>, vector<8x128xf32>,
    return
  }
  func.func @transform_0(%arg0: i32) -> (i32, i32) {
    %c0_i32 = arith.constant 0 : i32
    %c0_i32_0 = arith.constant 0 : i32
    return %arg0, %c0_i32 : i32, i32
  }
  func.func @transform_1(%arg0: i32) -> (i32, i32) {
    %c0_i32 = arith.constant 0 : i32
    %c0_i32_0 = arith.constant 0 : i32
    %c0_i32_1 = arith.constant 0 : i32
    return %c0_i32, %c0_i32_0 : i32, i32
  }
  func.func @transform_2(%arg0: i32) -> (i32, i32) {
    %c0_i32 = arith.constant 0 : i32
    %c0_i32_0 = arith.constant 0 : i32
    %c0_i32_1 = arith.constant 0 : i32
    return %c0_i32, %c0_i32_0 : i32, i32
  }
  func.func @transform_3(%arg0: i32) -> (i32, i32) {
    %c0_i32 = arith.constant 0 : i32
    %c0_i32_0 = arith.constant 0 : i32
    %c0_i32_1 = arith.constant 0 : i32
    return %c0_i32, %c0_i32_0 : i32, i32
  }
  func.func @transform_4(%arg0: i32) -> (i32, i32) {
    %c0_i32 = arith.constant 0 : i32
    %c0_i32_0 = arith.constant 0 : i32
    %c0_i32_1 = arith.constant 0 : i32
    return %c0_i32, %c0_i32_0 : i32, i32
  }
  func.func @transform_5(%arg0: i32) -> (i32, i32) {
    %c0_i32 = arith.constant 0 : i32
    %c0_i32_0 = arith.constant 0 : i32
    return %arg0, %c0_i32 : i32, i32
  }
}

</mosaic_0001>

<bundles_post_ra>
// kernel: tpu_custom_call.1
= control target key start
LH: loop header
LB: loop body
LE: loop exit
PB: predicated region body
PF: predicated region fallthrough
CT: control target
= control target key end

     0   :  { %10 = vsyncpa [#allocation3], 0  ;;  %s1956_s0 = inlined_call_operand.vmem [shape: bf16[128,160], index: 0, kind: input, shape index: {}]   ;;  %s1957_s1 = inlined_call_operand.hbm [shape: bf16[160,384], index: 1, kind: input, shape index: {}]   ;;  %s1958_s2 = inlined_call_operand.vmem [shape: f32[1,384], index: 2, kind: input, shape index: {}]   ;;  %s1959_s3 = inlined_call_operand.vmem [shape: bf16[384,128], index: 3, kind: input, shape index: {}]   ;;  %s1960_s4 = inlined_call_operand.vmem [shape: f32[1,128], index: 4, kind: input, shape index: {}]   ;;  %s1961_s5 = inlined_call_operand.hbm [shape: f32[8,128], index: 5, kind: output, shape index: {}]  }
   0x1   :  { %11 = vsyncpa [#allocation4], 0  ;;  %s1552_s18 = smov [#allocation2]   ;;  %s1504_s22 = scalar_lea.hbm %s1957_s1, 3840 }
   0x2   :  { %s19_s19 = sshll.u32 %s1552_s18, 4  ;;  %p1505_p0 = scmp.ne.s32.totalorder %s1957_s1, %s1504_s22  ;;  %s20_s19 = int_to_ptr.vmem [resolvable:$true] %s19_s19 }
   0x3   :  { %p1508_p1 = scmp.lt.u32.totalorder %s1504_s22, %s1957_s1 }
   0x5   :  { %p1510_p2 = pnand %p1508_p1, %p1505_p0 }
   0x7   :  { %1513 = shalt.err (!%p1510_p2)
}
   0x8   :  { %s1514_s27 = scalar_lea.vmem %s20_s19, 3840  ;;  %p1519_p4 = scmp.lt.s32.totalorder %s20_s19, %s20_s19 }
   0x9   :  { %p1515_p3 = scmp.ne.s32.totalorder %s20_s19, %s1514_s27  ;;  %p1520_p5 = scmp.lt.s32.totalorder %s1514_s27, %s1514_s27 }
   0xb   :  { %p1521_p6 = por %p1520_p5, %p1519_p4 }
   0xd   :  { %p1522_p7 = pnand %p1521_p6, %p1515_p3 }
   0xf   :  { %1525 = shalt.err (!%p1522_p7)
}
  0x10   :  { %s1553_s28 = smov 192   ;;  %s1554_s29 = smov 12  }
  0x11   :  { %25 = dma.hbm_to_vmem [thread:$0]  %s1957_s1, 3840, %s20_s19, [#allocation3], %s1553_s28, %s1553_s28, %s1554_s29  }
  0x12   :  { %1548 = dma.done.wait [#allocation3], 3840  }
  0x13   :  { %1549 = vsyncadd [#allocation3], 4294963456  ;;  %v1555_v0 = vmov 0   ;;  %v1416_v1 = vld [vmem:[#allocation2 + $0x4] ss:$12 sps:$4 sm:$0xff]   ;;  %vm341_vm0 = vcmask 261120  }
  0x14   :  { %479 = vmatprep.subr.bf16.mxu1 %v1555_v0  ;;  %v1418_v2 = vld [vmem:[#allocation2 + $0x8] ss:$12 sps:$4 sm:$0xff]   ;;  %366 = vmatprep.subr.bf16.mxu0 %v1416_v1  ;;  %v1419_v3 = vld [vmem:[#allocation2] ss:$12 sps:$4 sm:$0xff]   ;;  %v1423_v6 = vld [vmem:[#allocation2 + $0x18] ss:$12 sps:$4 sm:$0xff]  }
  0x15   :  { %480 = vmatpush1.bf16.msra.mxu1 %v1418_v2  ;;  %v1420_v4 = vld [vmem:[#allocation2 + $0x1c] ss:$12 sps:$4 sm:$0xff]   ;;  %367 = vmatpush1.bf16.msra.mxu0 %v1419_v3  ;;  %v1422_v5 = vld [vmem:[#allocation2 + $0x20] ss:$12 sps:$4 sm:$0xff]   ;;  %v1426_v8 = vld [vmem:[#allocation2 + $0x38] ss:$12 sps:$4 sm:$0xff]  }
  0x16   :  { %481 = vmatprep.subr.bf16.mxu1 %v1555_v0  ;;  %368 = vmatprep.subr.bf16.mxu0 %v1420_v4  ;;  %v1424_v7 = vld [vmem:[#allocation2 + $0x34] ss:$12 sps:$4 sm:$0xff]   ;;  %v1427_v9 = vld [vmem:[#allocation2 + $0x30] ss:$12 sps:$4 sm:$0xff]   ;;  %v1428_v10 = vld [vmem:[#allocation2 + $0x4c] ss:$12 sps:$4 sm:$0xff]  }
  0x17   :  { %v1430_v11 = vld [vmem:[#allocation2 + $0x50] ss:$12 sps:$4 sm:$0xff]   ;;  %v1431_v12 = vld [vmem:[#allocation2 + $0x48] ss:$12 sps:$4 sm:$0xff]   ;;  %v1435_v15 = vld [vmem:[#allocation2 + $0x60] ss:$12 sps:$4 sm:$0xff]  }
  0x18   :  { %v1432_v13 = vld [vmem:[#allocation2 + $0x64] ss:$12 sps:$4 sm:$0xff]   ;;  %v1434_v14 = vld [vmem:[#allocation2 + $0x68] ss:$12 sps:$4 sm:$0xff]   ;;  %v1438_v17 = vld [vmem:[#allocation2 + $0x80] ss:$12 sps:$4 sm:$0xff]  }
  0x19   :  { %482 = vmatpush1.bf16.msra.mxu1 %v1422_v5  ;;  %369 = vmatpush1.bf16.msra.mxu0 %v1423_v6  ;;  %v1436_v16 = vld [vmem:[#allocation2 + $0x7c] ss:$12 sps:$4 sm:$0xff]   ;;  %v1439_v18 = vld [vmem:[#allocation2 + $0x78] ss:$12 sps:$4 sm:$0xff]   ;;  %v1440_v19 = vld [vmem:[#allocation2 + $0x94] ss:$12 sps:$4 sm:$0xff]  }
  0x1a   :  { %483 = vmatprep.subr.bf16.mxu1 %v1555_v0  ;;  %370 = vmatprep.subr.bf16.mxu0 %v1424_v7  ;;  %v1442_v20 = vld [vmem:[#allocation2 + $0x98] ss:$12 sps:$4 sm:$0xff]   ;;  %v1443_v21 = vld [vmem:[#allocation2 + $0x90] ss:$12 sps:$4 sm:$0xff]   ;;  %v1447_v25 = vld [vmem:[#allocation2 + $0xa8] ss:$12 sps:$4 sm:$0xff]  }
  0x1b   :  { %v1458_v22 = vld [vmem:[%s1956_s0 + $0x4] ss:$8 sps:$4 sm:$0xff]   ;;  %v1446_v24 = vld [vmem:[#allocation2 + $0xb0] ss:$12 sps:$4 sm:$0xff]   ;;  %v1450_v27 = vld [vmem:[#allocation2 + $0xc8] ss:$12 sps:$4 sm:$0xff]  }
  0x1c   :  { %v1444_v23 = vld [vmem:[#allocation2 + $0xac] ss:$12 sps:$4 sm:$0xff]   ;;  %1325 = vmatprep.mubr.msk.bf16.mxu1 %vm341_vm0, %v1458_v22  ;;  %1317 = vmatprep.mubr.msk.bf16.mxu0 %vm341_vm0, %v1458_v22  ;;  %v1448_v26 = vld [vmem:[#allocation2 + $0xc4] ss:$12 sps:$4 sm:$0xff]   ;;  %v1452_v29 = vld [vmem:[#allocation2 + $0xdc] ss:$12 sps:$4 sm:$0xff]  }
  0x1d   :  { %484 = vmatpush1.bf16.msra.mxu1 %v1426_v8  ;;  %371 = vmatpush1.bf16.msra.mxu0 %v1427_v9  ;;  %v1451_v28 = vld [vmem:[#allocation2 + $0xc0] ss:$12 sps:$4 sm:$0xff]   ;;  %v1455_v31 = vld [vmem:[#allocation2 + $0xd8] ss:$12 sps:$4 sm:$0xff]   ;;  %v1459_v33 = vld [vmem:[%s1956_s0 + $0x14] ss:$8 sps:$4 sm:$0xff]   ;;  %v94_v8 = vlaneseq }
  0x1e   :  { %485 = vmatprep.subr.bf16.mxu1 %v1555_v0  ;;  %372 = vmatprep.subr.bf16.mxu0 %v1428_v10  ;;  %v1454_v30 = vld [vmem:[#allocation2 + $0xe0] ss:$12 sps:$4 sm:$0xff]   ;;  %v1461_v34 = vld [vmem:[%s1956_s0 + $0x10] ss:$8 sps:$4 sm:$0xff]   ;;  %v1465_v37 = vld [vmem:[%s1956_s0 + $0x34] ss:$8 sps:$4 sm:$0xff]  }
  0x1f   :  { %v1456_v32 = vld [vmem:[%s1956_s0] ss:$8 sps:$4 sm:$0xff]   ;;  %v1462_v35 = vld [vmem:[%s1956_s0 + $0x24] ss:$8 sps:$4 sm:$0xff]   ;;  %v1467_v38 = vld [vmem:[%s1956_s0 + $0x30] ss:$8 sps:$4 sm:$0xff]  }
  0x20   :  { %v1464_v36 = vld [vmem:[%s1956_s0 + $0x20] ss:$8 sps:$4 sm:$0xff]   ;;  %v1468_v39 = vld [vmem:[%s1956_s0 + $0x44] ss:$8 sps:$4 sm:$0xff]   ;;  %v1471_v41 = vld [vmem:[%s1956_s0 + $0x54] ss:$8 sps:$4 sm:$0xff]  }
  0x21   :  { %486 = vmatpush1.bf16.msra.mxu1 %v1430_v11  ;;  %373 = vmatpush1.bf16.msra.mxu0 %v1431_v12  ;;  %v1470_v40 = vld [vmem:[%s1956_s0 + $0x40] ss:$8 sps:$4 sm:$0xff]   ;;  %v1473_v42 = vld [vmem:[%s1956_s0 + $0x50] ss:$8 sps:$4 sm:$0xff]   ;;  %v1474_v43 = vld [vmem:[%s1956_s0 + $0x64] ss:$8 sps:$4 sm:$0xff]  }
  0x22   :  { %487 = vmatprep.subr.bf16.mxu1 %v1555_v0  ;;  %374 = vmatprep.subr.bf16.mxu0 %v1432_v13  ;;  %v1476_v44 = vld [vmem:[%s1956_s0 + $0x60] ss:$8 sps:$4 sm:$0xff]   ;;  %v1477_v45 = vld [vmem:[%s1956_s0 + $0x74] ss:$8 sps:$4 sm:$0xff]   ;;  %v1479_v46 = vld [vmem:[%s1956_s0 + $0x70] ss:$8 sps:$4 sm:$0xff]  }
  0x23   :  { %v1480_v47 = vld [vmem:[%s1959_s3 + $0x40] sm:$0xff]   ;;  %v1483_v50 = vld [vmem:[%s1959_s3 + $0x48] sm:$0xff]   ;;  %v1556_v52 = vmov 0.0   ;;  %v1486_v54 = vld [vmem:[%s1959_s3 + $0x50] sm:$0xff]   ;;  %vm1557_vm1 = vmmov 0   ;;  %v95_v9 = vshrl.u32 %v94_v8, 7 }
  0x24   :  { %v1481_v48 = vld [vmem:[%s1959_s3] sm:$0xff]   ;;  %v1484_v51 = vld [vmem:[%s1959_s3 + $0x8] sm:$0xff]   ;;  %v1487_v55 = vld [vmem:[%s1959_s3 + $0x10] sm:$0xff]   ;;  %vm997_vm5 = vcmask 1041409   ;;  %vm999_vm6 = vcmask 1042434   ;;  %vm1001_vm7 = vcmask 1043459  }
  0x25   :  { %488 = vmatpush1.bf16.msra.mxu1 %v1434_v14  ;;  %375 = vmatpush1.bf16.msra.mxu0 %v1435_v15  ;;  %v1482_v49 = vld [vmem:[%s1959_s3 + $0x80] sm:$0xff]   ;;  %v1485_v53 = vld [vmem:[%s1959_s3 + $0x88] sm:$0xff]   ;;  %v1488_v56 = vld [vmem:[%s1959_s3 + $0x90] sm:$0xff]   ;;  %v104_v10 = vsub.s32 2, %v95_v9  ;;  %v96_v12 = vsub.s32 0, %v95_v9  ;;  %v100_v13 = vsub.s32 1, %v95_v9 }
  0x26   :  { %489 = vmatprep.subr.bf16.mxu1 %v1555_v0  ;;  %376 = vmatprep.subr.bf16.mxu0 %v1436_v16  ;;  %v1489_v57 = vld [vmem:[%s1959_s3 + $0x58] sm:$0xff]   ;;  %v1492_v60 = vld [vmem:[%s1959_s3 + $0x60] sm:$0xff]   ;;  %v1497_v63 = vld [vmem:[%s1959_s3 + $0xa8] sm:$0xff]   ;;  %vm1003_vm8 = vcmask 1044484   ;;  %vm1005_vm9 = vcmask 1045509   ;;  %vm1007_vm10 = vcmask 1046534  }
  0x27   :  { %v1491_v58 = vld [vmem:[%s1959_s3 + $0x98] sm:$0xff]   ;;  %v1493_v61 = vld [vmem:[%s1959_s3 + $0x20] sm:$0xff]   ;;  %v1496_v1 = vld [vmem:[%s1959_s3 + $0x28] sm:$0xff]   ;;  %vm1009_vm11 = vcmask 1047559   ;;  %s1558_s8 = smov [#allocation5]  }
  0x28   :  { %v1490_v59 = vld [vmem:[%s1959_s3 + $0x18] sm:$0xff]   ;;  %v1494_v62 = vld [vmem:[%s1959_s3 + $0xa0] sm:$0xff]   ;;  %v1500_v2 = vld [vmem:[%s1959_s3 + $0xb0] sm:$0xff]   ;;  %s1262_s9 = sshll.u32 %s1558_s8, 4  ;;  %s1263_s9 = int_to_ptr.vmem [resolvable:$true] %s1262_s9 }
  0x29   :  { %490 = vmatpush1.bf16.msra.mxu1 %v1438_v17  ;;  %377 = vmatpush1.bf16.msra.mxu0 %v1439_v18  ;;  %v1498_v3 = vld [vmem:[%s1959_s3 + $0x70] sm:$0xff]   ;;  %v1501_v5 = vld [vmem:[%s1959_s3 + $0x78] sm:$0xff]   ;;  %v92_v11 = vld [vmem:[%s1958_s2] sm:$0x7]  ;;  %v1756_v18 = vadd.s32 8, %v95_v9  ;;  %s1526_s10 = scalar_lea.vmem %s1263_s9, 128  ;;  %p1531_p9 = scmp.lt.s32.totalorder %s1263_s9, %s1263_s9 }
  0x2a   :  { %491 = vmatprep.subr.bf16.mxu1 %v1555_v0  ;;  %378 = vmatprep.subr.bf16.mxu0 %v1440_v19  ;;  %v1499_v4 = vld [vmem:[%s1959_s3 + $0x30] sm:$0xff]   ;;  %v1503_v6 = vld [vmem:[%s1959_s3 + $0xb8] sm:$0xff]   ;;  %v1750_v14 = vrot.slane %v92_v11, %v104_v10  ;;  %v1752_v15 = vrot.slane %v92_v11, %v96_v12  ;;  %v1754_v17 = vrot.slane %v92_v11, %v100_v13  ;;  %p1527_p8 = scmp.ne.s32.totalorder %s1263_s9, %s1526_s10  ;;  %p1532_p10 = scmp.lt.s32.totalorder %s1526_s10, %s1526_s10 }
  0x2b   :  { %v1502_v7 = vld [vmem:[%s1959_s3 + $0x38] sm:$0xff]   ;;  %vm641_vm2 = vcmp.lt.s32.totalorder %v1756_v18, 12  ;;  %vm639_vm3 = vcmp.lt.s32.totalorder %v1756_v18, 14  ;;  %vm640_vm4 = vcmp.lt.s32.totalorder %v1756_v18, 13 }
  0x2c   :  { %p1533_p11 = por %p1532_p10, %p1531_p9 }
  0x2d   :  { %492 = vmatpush1.bf16.msra.mxu1 %v1442_v20  ;;  %379 = vmatpush1.bf16.msra.mxu0 %v1443_v21 }
  0x2e   :  { %493 = vmatprep.subr.bf16.mxu1 %v1555_v0  ;;  %380 = vmatprep.subr.bf16.mxu0 %v1444_v23  ;;  %p1534_p12 = pnand %p1533_p11, %p1527_p8 }
  0x31   :  { %494 = vmatpush1.bf16.msra.mxu1 %v1446_v24  ;;  %381 = vmatpush1.bf16.msra.mxu0 %v1447_v25 }
  0x32   :  { %495 = vmatprep.subr.bf16.mxu1 %v1555_v0  ;;  %382 = vmatprep.subr.bf16.mxu0 %v1448_v26 }
  0x35   :  { %496 = vmatpush1.bf16.msra.mxu1 %v1450_v27  ;;  %383 = vmatpush1.bf16.msra.mxu0 %v1451_v28 }
  0x36   :  { %497 = vmatprep.subr.bf16.mxu1 %v1555_v0  ;;  %384 = vmatprep.subr.bf16.mxu0 %v1452_v29  ;;  %v1495_v0 = vld [vmem:[%s1959_s3 + $0x68] sm:$0xff]  }
  0x39   :  { %498 = vmatpush1.bf16.msra.mxu1 %v1454_v30  ;;  %385 = vmatpush1.bf16.msra.mxu0 %v1455_v31 }
  0x3a   :  { %1358 = vmatprep.subr.bf16.mxu0 %v1480_v47  ;;  %1389 = vmatprep.subr.bf16.mxu1 %v1556_v52 }
  0x3c   :  { %512 = vmatmul.mubr.bf16.vlgmr.msra.gmra.mrb[0].mxu1 %v1456_v32  ;;  %399 = vmatmul.mubr.bf16.vlgmr.msra.gmra.mrb[0].mxu0 %v1456_v32 }
  0x3d   :  { %1326 = vmatprep.mubr.msk.bf16.mxu1 %vm341_vm0, %v1459_v33  ;;  %1318 = vmatprep.mubr.msk.bf16.mxu0 %vm341_vm0, %v1459_v33 }
  0x3e   :  { %1359 = vmatpush3.bf16.msra.mxu0 %v1481_v48  ;;  %1390 = vmatpush3.bf16.msra.mxu1 %v1482_v49 }
  0x3f   :  { %1360 = vmatprep.subr.bf16.mxu0 %v1483_v50  ;;  %1391 = vmatprep.subr.bf16.mxu1 %v1556_v52 }
  0x42   :  { %1361 = vmatpush3.bf16.msra.mxu0 %v1484_v51  ;;  %1392 = vmatpush3.bf16.msra.mxu1 %v1485_v53 }
  0x43   :  { %1393 = vmatprep.subr.bf16.mxu1 %v1556_v52  ;;  %1362 = vmatprep.subr.bf16.mxu0 %v1486_v54 }
  0x44   :  { %520 = vmatmul.mubr.bf16.gmra.mrb[4].mxu1 %v1461_v34  ;;  %409 = vmatmul.mubr.bf16.gmra.mrb[4].mxu0 %v1461_v34 }
  0x45   :  { %1327 = vmatprep.mubr.msk.bf16.mxu1 %vm341_vm0, %v1462_v35  ;;  %1319 = vmatprep.mubr.msk.bf16.mxu0 %vm341_vm0, %v1462_v35 }
  0x46   :  { %1363 = vmatpush3.bf16.msra.mxu0 %v1487_v55  ;;  %1394 = vmatpush3.bf16.msra.mxu1 %v1488_v56 }
  0x47   :  { %1395 = vmatprep.subr.bf16.mxu1 %v1556_v52  ;;  %1364 = vmatprep.subr.bf16.mxu0 %v1489_v57 }
  0x4a   :  { %1396 = vmatpush3.bf16.msra.mxu1 %v1491_v58  ;;  %1365 = vmatpush3.bf16.msra.mxu0 %v1490_v59 }
  0x4b   :  { %1397 = vmatprep.subr.bf16.mxu1 %v1556_v52  ;;  %1366 = vmatprep.subr.bf16.mxu0 %v1492_v60 }
  0x4c   :  { %528 = vmatmul.mubr.bf16.gmra.mrb[8].mxu1 %v1464_v36  ;;  %419 = vmatmul.mubr.bf16.gmra.mrb[8].mxu0 %v1464_v36 }
  0x4d   :  { %1328 = vmatprep.mubr.msk.bf16.mxu1 %vm341_vm0, %v1465_v37  ;;  %1320 = vmatprep.mubr.msk.bf16.mxu0 %vm341_vm0, %v1465_v37 }
  0x4e   :  { %1367 = vmatpush3.bf16.msra.mxu0 %v1493_v61  ;;  %1398 = vmatpush3.bf16.msra.mxu1 %v1494_v62 }
  0x4f   :  { %1399 = vmatprep.subr.bf16.mxu1 %v1556_v52  ;;  %1368 = vmatprep.subr.bf16.mxu0 %v1495_v0 }
  0x52   :  { %1400 = vmatpush3.bf16.msra.mxu1 %v1497_v63  ;;  %1369 = vmatpush3.bf16.msra.mxu0 %v1496_v1 }
  0x53   :  { %1401 = vmatprep.subr.bf16.mxu1 %v1556_v52  ;;  %1370 = vmatprep.subr.bf16.mxu0 %v1498_v3 }
  0x54   :  { %536 = vmatmul.mubr.bf16.gmra.mrb[12].mxu1 %v1467_v38  ;;  %429 = vmatmul.mubr.bf16.gmra.mrb[12].mxu0 %v1467_v38 }
  0x55   :  { %1329 = vmatprep.mubr.msk.bf16.mxu1 %vm341_vm0, %v1468_v39  ;;  %1321 = vmatprep.mubr.msk.bf16.mxu0 %vm341_vm0, %v1468_v39 }
  0x56   :  { %1402 = vmatpush3.bf16.msra.mxu1 %v1500_v2  ;;  %1371 = vmatpush3.bf16.msra.mxu0 %v1499_v4 }
  0x57   :  { %1403 = vmatprep.subr.bf16.mxu1 %v1556_v52  ;;  %1372 = vmatprep.subr.bf16.mxu0 %v1501_v5 }
  0x5a   :  { %1404 = vmatpush3.bf16.msra.mxu1 %v1503_v6  ;;  %1373 = vmatpush3.bf16.msra.mxu0 %v1502_v7 }
  0x5c   :  { %544 = vmatmul.mubr.bf16.gmra.mrb[16].mxu1 %v1470_v40  ;;  %439 = vmatmul.mubr.bf16.gmra.mrb[16].mxu0 %v1470_v40 }
  0x5d   :  { %1330 = vmatprep.mubr.msk.bf16.mxu1 %vm341_vm0, %v1471_v41  ;;  %1322 = vmatprep.mubr.msk.bf16.mxu0 %vm341_vm0, %v1471_v41 }
  0x64   :  { %552 = vmatmul.mubr.bf16.gmra.mrb[20].mxu1 %v1473_v42  ;;  %449 = vmatmul.mubr.bf16.gmra.mrb[20].mxu0 %v1473_v42 }
  0x65   :  { %1331 = vmatprep.mubr.msk.bf16.mxu1 %vm341_vm0, %v1474_v43  ;;  %1323 = vmatprep.mubr.msk.bf16.mxu0 %vm341_vm0, %v1474_v43 }
  0x6c   :  { %560 = vmatmul.mubr.bf16.gmra.mrb[24].mxu1 %v1476_v44  ;;  %459 = vmatmul.mubr.bf16.gmra.mrb[24].mxu0 %v1476_v44 }
  0x6d   :  { %1332 = vmatprep.mubr.msk.bf16.mxu1 %vm341_vm0, %v1477_v45  ;;  %1324 = vmatprep.mubr.msk.bf16.mxu0 %vm341_vm0, %v1477_v45 }
  0x74   :  { %568 = vmatmul.mubr.bf16.gmra.mrb[28].mxu1 %v1479_v46  ;;  %469 = vmatmul.mubr.bf16.gmra.mrb[28].mxu0 %v1479_v46 }
  0x75   :  { %1405 = vmatprep.mubr.msk.bf16.mxu1 %vm1557_vm1, %v1556_v52 }
 0x10f   :  { %v513_v16 = vpop.f32.mrb[0].mxu1  ;;  %v400_v20 = vpop.f32.mrb[0].mxu0 }
 0x110   :  { %v514_v19 = vadd.f32 %v513_v16, %v1750_v14  ;;  %v515_v21 = vpop.f32.mrb[1].mxu1  ;;  %v402_v22 = vpop.f32.mrb[1].mxu0  ;;  %v401_v24 = vadd.f32 %v400_v20, %v1752_v15 }
 0x111   :  { %v516_v23 = vpop.f32.mrb[2].mxu1  ;;  %v404_v26 = vpop.f32.mrb[2].mxu0  ;;  %v403_v29 = vadd.f32 %v402_v22, %v1754_v17 }
 0x112   :  { %v517_v25 = vadd.f32 %v516_v23, %v1750_v14  ;;  %v518_v27 = vpop.f32.mrb[3].mxu1  ;;  %v578_v28 = vmax.f32 %v514_v19, 0.0  ;;  %v405_v30 = vadd.f32 %v404_v26, %v1752_v15  ;;  %v406_v31 = vpop.f32.mrb[3].mxu0  ;;  %v576_v35 = vmax.f32 %v401_v24, 0.0 }
 0x113   :  { %v407_v33 = vadd.f32 %v406_v31, %v1754_v17  ;;  %v577_v38 = vmax.f32 %v403_v29, 0.0 }
 0x114   :  { %v581_v32 = vmax.f32 %v517_v25, 0.0  ;;  %v579_v34 = vmax.f32 %v405_v30, 0.0 }
 0x115   :  { %v580_v37 = vmax.f32 %v407_v33, 0.0 }
 0x116   :  { %v659_v36 = vsel %vm641_vm2, %v581_v32, 0.0  ;;  %v657_v40 = vsel %vm639_vm3, %v579_v34, 0.0 }
 0x117   :  { %v716_v39 = vmax.f32 %v578_v28, %v659_v36  ;;  %v521_v41 = vpop.f32.mrb[4].mxu1  ;;  %v702_v42 = vmax.f32 %v576_v35, %v657_v40  ;;  %v658_v43 = vsel %vm640_vm4, %v580_v37, 0.0  ;;  %v410_v45 = vpop.f32.mrb[4].mxu0 }
 0x118   :  { %v522_v44 = vadd.f32 %v521_v41, %v1750_v14  ;;  %v523_v46 = vpop.f32.mrb[5].mxu1  ;;  %v709_v48 = vmax.f32 %v577_v38, %v658_v43  ;;  %v411_v49 = vadd.f32 %v410_v45, %v1752_v15  ;;  %v412_v50 = vpop.f32.mrb[5].mxu0 }
 0x119   :  { %v717_v47 = vrot.slane %v716_v39, 4  ;;  %v524_v51 = vpop.f32.mrb[6].mxu1  ;;  %v703_v52 = vrot.slane %v702_v42, 4  ;;  %v413_v53 = vadd.f32 %v412_v50, %v1754_v17  ;;  %v414_v55 = vpop.f32.mrb[6].mxu0 }
 0x11a   :  { %v525_v54 = vadd.f32 %v524_v51, %v1750_v14  ;;  %v526_v56 = vpop.f32.mrb[7].mxu1  ;;  %v710_v58 = vrot.slane %v709_v48, 4  ;;  %v584_v59 = vmax.f32 %v522_v44, 0.0  ;;  %v415_v60 = vadd.f32 %v414_v55, %v1752_v15  ;;  %v416_v61 = vpop.f32.mrb[7].mxu0 }
 0x11b   :  { %v718_v57 = vmax.f32 %v716_v39, %v717_v47  ;;  %v704_v62 = vmax.f32 %v702_v42, %v703_v52  ;;  %v417_v0 = vadd.f32 %v416_v61, %v1754_v17  ;;  %v582_v3 = vmax.f32 %v411_v49, 0.0 }
 0x11c   :  { %v587_v63 = vmax.f32 %v525_v54, 0.0  ;;  %v711_v2 = vmax.f32 %v709_v48, %v710_v58  ;;  %v585_v4 = vmax.f32 %v415_v60, 0.0  ;;  %v583_v6 = vmax.f32 %v413_v53, 0.0 }
 0x11d   :  { %v719_v1 = vrot.slane %v718_v57, 2  ;;  %v705_v5 = vrot.slane %v704_v62, 2  ;;  %v586_v8 = vmax.f32 %v417_v0, 0.0 }
 0x11e   :  { %v665_v7 = vsel %vm641_vm2, %v587_v63, 0.0  ;;  %v712_v10 = vrot.slane %v711_v2, 2  ;;  %v663_v12 = vsel %vm639_vm3, %v585_v4, 0.0 }
 0x11f   :  { %v720_v9 = vmax.f32 %v718_v57, %v719_v1  ;;  %v737_v11 = vmax.f32 %v584_v59, %v665_v7  ;;  %v529_v13 = vpop.f32.mrb[8].mxu1  ;;  %v706_v16 = vmax.f32 %v704_v62, %v705_v5  ;;  %v723_v19 = vmax.f32 %v582_v3, %v663_v12  ;;  %v420_v22 = vpop.f32.mrb[8].mxu0 }
 0x120   :  { %v664_v20 = vsel %vm640_vm4, %v586_v8, 0.0  ;;  %v530_v21 = vadd.f32 %v529_v13, %v1750_v14  ;;  %v531_v23 = vpop.f32.mrb[9].mxu1  ;;  %v713_v25 = vmax.f32 %v711_v2, %v712_v10  ;;  %v422_v28 = vpop.f32.mrb[9].mxu0  ;;  %v421_v32 = vadd.f32 %v420_v22, %v1752_v15 }
 0x121   :  { %v721_v24 = vrot.slane %v720_v9, 1  ;;  %v738_v26 = vrot.slane %v737_v11, 4  ;;  %v730_v27 = vmax.f32 %v583_v6, %v664_v20  ;;  %v532_v29 = vpop.f32.mrb[10].mxu1  ;;  %v707_v30 = vrot.slane %v706_v16, 1  ;;  %v424_v33 = vpop.f32.mrb[10].mxu0 }
 0x122   :  { %v724_v31 = vrot.slane %v723_v19, 4  ;;  %v534_v34 = vpop.f32.mrb[11].mxu1  ;;  %v714_v36 = vrot.slane %v713_v25, 1  ;;  %v426_v39 = vpop.f32.mrb[11].mxu0  ;;  %v590_v42 = vmax.f32 %v530_v21, 0.0  ;;  %v423_v43 = vadd.f32 %v422_v28, %v1754_v17 }
 0x123   :  { %v722_v35 = vmax.f32 %v720_v9, %v721_v24  ;;  %v739_v37 = vmax.f32 %v737_v11, %v738_v26  ;;  %v731_v38 = vrot.slane %v730_v27, 4  ;;  %v708_v40 = vmax.f32 %v706_v16, %v707_v30 }
 0x124   :  { %v725_v41 = vmax.f32 %v723_v19, %v724_v31  ;;  %v715_v45 = vmax.f32 %v713_v25, %v714_v36  ;;  %v588_v50 = vmax.f32 %v421_v32, 0.0  ;;  %v533_v51 = vadd.f32 %v532_v29, %v1750_v14 }
 0x125   :  { %v872_v44 = vpack.c.bf16 %v722_v35, %v722_v35  ;;  %v740_v46 = vrot.slane %v739_v37, 2  ;;  %v732_v47 = vmax.f32 %v730_v27, %v731_v38  ;;  %v870_v48 = vpack.c.bf16 %v708_v40, %v708_v40 }
 0x126   :  { %v726_v49 = vrot.slane %v725_v41, 2  ;;  %v589_v55 = vmax.f32 %v423_v43, 0.0  ;;  %v871_v57 = vpack.c.bf16 %v715_v45, %v715_v45  ;;  %v593_v59 = vmax.f32 %v533_v51, 0.0 }
 0x127   :  { %v975_v52 = vunpack.c.l.b16 %v872_v44  ;;  %v741_v53 = vmax.f32 %v739_v37, %v740_v46  ;;  %v733_v54 = vrot.slane %v732_v47, 2  ;;  %v537_v56 = vpop.f32.mrb[12].mxu1  ;;  %v425_v60 = vadd.f32 %v424_v33, %v1752_v15  ;;  %v430_v61 = vpop.f32.mrb[12].mxu0 }
 0x128   :  { %v727_v58 = vmax.f32 %v725_v41, %v726_v49  ;;  %v539_v62 = vpop.f32.mrb[13].mxu1  ;;  %v973_v63 = vunpack.c.l.b16 %v870_v48  ;;  %v427_v2 = vadd.f32 %v426_v39, %v1754_v17  ;;  %v432_v3 = vpop.f32.mrb[13].mxu0  ;;  %v671_v6 = vsel %vm641_vm2, %v593_v59, 0.0 }
 0x129   :  { %v742_v0 = vrot.slane %v741_v53, 1  ;;  %v734_v1 = vmax.f32 %v732_v47, %v733_v54  ;;  %v540_v4 = vpop.f32.mrb[14].mxu1  ;;  %v591_v7 = vmax.f32 %v425_v60, 0.0  ;;  %v538_v8 = vadd.f32 %v537_v56, %v1750_v14  ;;  %v434_v9 = vpop.f32.mrb[14].mxu0 }
 0x12a   :  { %v728_v5 = vrot.slane %v727_v58, 1  ;;  %v542_v10 = vpop.f32.mrb[15].mxu1  ;;  %v758_v13 = vmax.f32 %v590_v42, %v671_v6  ;;  %v592_v16 = vmax.f32 %v427_v2, 0.0  ;;  %v436_v19 = vpop.f32.mrb[15].mxu0  ;;  %v974_v20 = vunpack.c.l.b16 %v871_v57 }
 0x12b   :  { %v743_v11 = vmax.f32 %v741_v53, %v742_v0  ;;  %v735_v12 = vrot.slane %v734_v1, 1  ;;  %v669_v22 = vsel %vm639_vm3, %v591_v7, 0.0  ;;  %v431_v23 = vadd.f32 %v430_v61, %v1752_v15 }
 0x12c   :  { %v729_v21 = vmax.f32 %v727_v58, %v728_v5  ;;  %v759_v26 = vrot.slane %v758_v13, 4  ;;  %v744_v27 = vmax.f32 %v588_v50, %v669_v22  ;;  %v670_v29 = vsel %vm640_vm4, %v592_v16, 0.0 }
 0x12d   :  { %v875_v24 = vpack.c.bf16 %v743_v11, %v743_v11  ;;  %v736_v25 = vmax.f32 %v734_v1, %v735_v12  ;;  %v596_v30 = vmax.f32 %v538_v8, 0.0  ;;  %v594_v31 = vmax.f32 %v431_v23, 0.0 }
 0x12e   :  { %v873_v28 = vpack.c.bf16 %v729_v21, %v729_v21  ;;  %v760_v34 = vmax.f32 %v758_v13, %v759_v26  ;;  %v745_v35 = vrot.slane %v744_v27, 4  ;;  %v751_v38 = vmax.f32 %v589_v55, %v670_v29 }
 0x12f   :  { %v978_v32 = vunpack.c.l.b16 %v875_v24  ;;  %v874_v33 = vpack.c.bf16 %v736_v25, %v736_v25  ;;  %v545_v36 = vpop.f32.mrb[16].mxu1  ;;  %v433_v39 = vadd.f32 %v432_v3, %v1754_v17  ;;  %v541_v40 = vadd.f32 %v540_v4, %v1750_v14  ;;  %v440_v41 = vpop.f32.mrb[16].mxu0 }
 0x130   :  { %v976_v37 = vunpack.c.l.b16 %v873_v28  ;;  %v547_v42 = vpop.f32.mrb[17].mxu1  ;;  %v761_v45 = vrot.slane %v760_v34, 2  ;;  %v746_v46 = vmax.f32 %v744_v27, %v745_v35  ;;  %v442_v47 = vpop.f32.mrb[17].mxu0  ;;  %v752_v50 = vrot.slane %v751_v38, 4 }
 0x131   :  { %v1802_v43 = vsel %vm997_vm5, %v978_v32, %v975_v52  ;;  %v977_v44 = vunpack.c.l.b16 %v874_v33  ;;  %v548_v48 = vpop.f32.mrb[18].mxu1  ;;  %v599_v51 = vmax.f32 %v541_v40, 0.0  ;;  %v435_v53 = vadd.f32 %v434_v9, %v1752_v15  ;;  %v444_v54 = vpop.f32.mrb[18].mxu0 }
 0x132   :  { %v1805_v49 = vsel %vm997_vm5, %v976_v37, %v973_v63  ;;  %v550_v55 = vpop.f32.mrb[19].mxu1  ;;  %v762_v52 = vmax.f32 %v760_v34, %v761_v45  ;;  %v747_v57 = vrot.slane %v746_v46, 2  ;;  %v437_v58 = vadd.f32 %v436_v19, %v1754_v17  ;;  %v446_v59 = vpop.f32.mrb[19].mxu0 }
 0x133   :  { %v1809_v56 = vsel %vm997_vm5, %v977_v44, %v974_v20  ;;  %v753_v60 = vmax.f32 %v751_v38, %v752_v50  ;;  %v677_v61 = vsel %vm641_vm2, %v599_v51, 0.0  ;;  %v597_v62 = vmax.f32 %v435_v53, 0.0 }
 0x134   :  { %v546_v63 = vadd.f32 %v545_v36, %v1750_v14  ;;  %v763_v0 = vrot.slane %v762_v52, 1  ;;  %v748_v1 = vmax.f32 %v746_v46, %v747_v57  ;;  %v779_v2 = vmax.f32 %v596_v30, %v677_v61 }
 0x135   :  { %v598_v3 = vmax.f32 %v437_v58, 0.0  ;;  %v754_v4 = vrot.slane %v753_v60, 2  ;;  %v595_v5 = vmax.f32 %v433_v39, 0.0  ;;  %v675_v6 = vsel %vm639_vm3, %v597_v62, 0.0 }
 0x136   :  { %v441_v7 = vadd.f32 %v440_v41, %v1752_v15  ;;  %v764_v8 = vmax.f32 %v762_v52, %v763_v0  ;;  %v749_v9 = vrot.slane %v748_v1, 1  ;;  %v780_v10 = vrot.slane %v779_v2, 4 }
 0x137   :  { %v765_v11 = vmax.f32 %v594_v31, %v675_v6  ;;  %v553_v12 = vpop.f32.mrb[20].mxu1  ;;  %v755_v13 = vmax.f32 %v753_v60, %v754_v4  ;;  %v676_v16 = vsel %vm640_vm4, %v598_v3, 0.0  ;;  %v602_v19 = vmax.f32 %v546_v63, 0.0  ;;  %v1820_v21 = vpop.f32.mrb[20].mxu0 }
 0x138   :  { %v600_v20 = vmax.f32 %v441_v7, 0.0  ;;  %v555_v22 = vpop.f32.mrb[21].mxu1  ;;  %v878_v23 = vpack.c.bf16 %v764_v8, %v764_v8  ;;  %v750_v24 = vmax.f32 %v748_v1, %v749_v9  ;;  %v781_v25 = vmax.f32 %v779_v2, %v780_v10  ;;  %v1822_v27 = vpop.f32.mrb[21].mxu0 }
 0x139   :  { %v766_v26 = vrot.slane %v765_v11, 4  ;;  %v1824_v28 = vpop.f32.mrb[22].mxu1  ;;  %v756_v29 = vrot.slane %v755_v13, 1  ;;  %v772_v30 = vmax.f32 %v595_v5, %v676_v16  ;;  %v443_v31 = vadd.f32 %v442_v47, %v1754_v17  ;;  %v1828_v33 = vpop.f32.mrb[22].mxu0 }
 0x13a   :  { %v549_v32 = vadd.f32 %v548_v48, %v1750_v14  ;;  %v558_v34 = vpop.f32.mrb[23].mxu1  ;;  %v981_v35 = vunpack.c.l.b16 %v878_v23  ;;  %v876_v36 = vpack.c.bf16 %v750_v24, %v750_v24  ;;  %v782_v37 = vrot.slane %v781_v25, 2  ;;  %v1830_v39 = vpop.f32.mrb[23].mxu0 }
 0x13b   :  { %v767_v38 = vmax.f32 %v765_v11, %v766_v26  ;;  %v757_v40 = vmax.f32 %v755_v13, %v756_v29  ;;  %v773_v41 = vrot.slane %v772_v30, 4  ;;  %v445_v44 = vadd.f32 %v444_v54, %v1752_v15 }
 0x13c   :  { %v605_v42 = vmax.f32 %v549_v32, 0.0  ;;  %v1019_v45 = vsel %vm999_vm6, %v981_v35, %v1802_v43  ;;  %v979_v46 = vunpack.c.l.b16 %v876_v36  ;;  %v783_v47 = vmax.f32 %v781_v25, %v782_v37 }
 0x13d   :  { %v768_v48 = vrot.slane %v767_v38, 2  ;;  %v877_v50 = vpack.c.bf16 %v757_v40, %v757_v40  ;;  %v774_v51 = vmax.f32 %v772_v30, %v773_v41  ;;  %v603_v55 = vmax.f32 %v445_v44, 0.0 }
 0x13e   :  { %v683_v53 = vsel %vm641_vm2, %v605_v42, 0.0  ;;  %v1000_v52 = vsel %vm999_vm6, %v979_v46, %v1805_v49  ;;  %v784_v57 = vrot.slane %v783_v47, 1  ;;  %v601_v62 = vmax.f32 %v443_v31, 0.0 }
 0x13f   :  { %v769_v58 = vmax.f32 %v767_v38, %v768_v48  ;;  %v800_v60 = vmax.f32 %v602_v19, %v683_v53  ;;  %v1839_v61 = vpop.f32.mrb[24].mxu1  ;;  %v775_v54 = vrot.slane %v774_v51, 2  ;;  %v681_v43 = vsel %vm639_vm3, %v603_v55, 0.0  ;;  %v1844_v0 = vpop.f32.mrb[24].mxu0 }
 0x140   :  { %v447_v63 = vadd.f32 %v446_v59, %v1754_v17  ;;  %v563_v1 = vpop.f32.mrb[25].mxu1  ;;  %v785_v2 = vmax.f32 %v783_v47, %v784_v57  ;;  %v786_v5 = vmax.f32 %v600_v20, %v681_v43  ;;  %v1846_v49 = vpop.f32.mrb[25].mxu0  ;;  %v1850_v7 = vunpack.c.l.b16 %v877_v50 }
 0x141   :  { %v770_v3 = vrot.slane %v769_v58, 1  ;;  %v801_v4 = vrot.slane %v800_v60, 4  ;;  %v1848_v6 = vpop.f32.mrb[26].mxu1  ;;  %v776_v8 = vmax.f32 %v774_v51, %v775_v54  ;;  %v554_v10 = vadd.f32 %v553_v12, %v1750_v14  ;;  %v1853_v11 = vpop.f32.mrb[26].mxu0 }
 0x142   :  { %v604_v9 = vmax.f32 %v447_v63, 0.0  ;;  %v566_v59 = vpop.f32.mrb[27].mxu1  ;;  %v881_v13 = vpack.c.bf16 %v785_v2, %v785_v2  ;;  %v787_v22 = vrot.slane %v786_v5, 4  ;;  %v1855_v23 = vpop.f32.mrb[27].mxu0  ;;  %v451_v26 = vadd.f32 %v1820_v21, %v1752_v15 }
 0x143   :  { %v771_v16 = vmax.f32 %v769_v58, %v770_v3  ;;  %v802_v19 = vmax.f32 %v800_v60, %v801_v4  ;;  %v777_v20 = vrot.slane %v776_v8, 1  ;;  %v608_v25 = vmax.f32 %v554_v10, 0.0 }
 0x144   :  { %v682_v24 = vsel %vm640_vm4, %v604_v9, 0.0  ;;  %v984_v29 = vunpack.c.l.b16 %v881_v13  ;;  %v788_v31 = vmax.f32 %v786_v5, %v787_v22  ;;  %v453_v35 = vadd.f32 %v1822_v27, %v1754_v17 }
 0x145   :  { %v879_v30 = vpack.c.bf16 %v771_v16, %v771_v16  ;;  %v803_v12 = vrot.slane %v802_v19, 2  ;;  %v778_v32 = vmax.f32 %v776_v8, %v777_v20  ;;  %v793_v34 = vmax.f32 %v601_v62, %v682_v24 }
 0x146   :  { %v557_v36 = vadd.f32 %v1824_v28, %v1750_v14  ;;  %v1020_v37 = vsel %vm1001_vm7, %v984_v29, %v1019_v45  ;;  %v789_v41 = vrot.slane %v788_v31, 2  ;;  %v606_v46 = vmax.f32 %v451_v26, 0.0 }
 0x147   :  { %v982_v38 = vunpack.c.l.b16 %v879_v30  ;;  %v804_v40 = vmax.f32 %v802_v19, %v803_v12  ;;  %v1866_v42 = vpop.f32.mrb[28].mxu1  ;;  %v880_v21 = vpack.c.bf16 %v778_v32, %v778_v32  ;;  %v794_v44 = vrot.slane %v793_v34, 4  ;;  %v1868_v48 = vpop.f32.mrb[28].mxu0 }
 0x148   :  { %v611_v47 = vmax.f32 %v557_v36, 0.0  ;;  %v571_v50 = vpop.f32.mrb[29].mxu1  ;;  %v790_v53 = vmax.f32 %v788_v31, %v789_v41  ;;  %v455_v28 = vadd.f32 %v1828_v33, %v1752_v15  ;;  %v1873_v45 = vpop.f32.mrb[29].mxu0  ;;  %v607_v58 = vmax.f32 %v453_v35, 0.0 }
 0x149   :  { %v1002_v51 = vsel %vm1001_vm7, %v982_v38, %v1000_v52  ;;  %v805_v27 = vrot.slane %v804_v40, 1  ;;  %v1875_v55 = vpop.f32.mrb[30].mxu1  ;;  %v795_v57 = vmax.f32 %v793_v34, %v794_v44  ;;  %v457_v54 = vadd.f32 %v1830_v39, %v1754_v17  ;;  %v1881_v62 = vpop.f32.mrb[30].mxu0 }
 0x14a   :  { %v689_v60 = vsel %vm641_vm2, %v611_v47, 0.0  ;;  %v574_v52 = vpop.f32.mrb[31].mxu1  ;;  %v791_v63 = vrot.slane %v790_v53, 1  ;;  %v609_v2 = vmax.f32 %v455_v28, 0.0  ;;  %v1883_v33 = vpop.f32.mrb[31].mxu0  ;;  %v1885_v3 = vunpack.c.l.b16 %v880_v21 }
 0x14b   :  { %v806_v43 = vmax.f32 %v804_v40, %v805_v27  ;;  %v821_v1 = vmax.f32 %v608_v25, %v689_v60  ;;  %v796_v4 = vrot.slane %v795_v57, 2  ;;  %v610_v5 = vmax.f32 %v457_v54, 0.0 }
 0x14c   :  { %v562_v8 = vadd.f32 %v1839_v61, %v1750_v14  ;;  %v792_v10 = vmax.f32 %v790_v53, %v791_v63  ;;  %v687_v39 = vsel %vm639_vm3, %v609_v2, 0.0  ;;  %v461_v22 = vadd.f32 %v1844_v0, %v1752_v15 }
 0x14d   :  { %v884_v9 = vpack.c.bf16 %v806_v43, %v806_v43  ;;  %v822_v59 = vrot.slane %v821_v1, 4  ;;  %v797_v13 = vmax.f32 %v795_v57, %v796_v4  ;;  %v807_v16 = vmax.f32 %v606_v46, %v687_v39 }
 0x14e   :  { %v688_v19 = vsel %vm640_vm4, %v610_v5, 0.0  ;;  %v882_v24 = vpack.c.bf16 %v792_v10, %v792_v10  ;;  %v614_v30 = vmax.f32 %v562_v8, 0.0  ;;  %v463_v12 = vadd.f32 %v1846_v49, %v1754_v17 }
 0x14f   :  { %v987_v20 = vunpack.c.l.b16 %v884_v9  ;;  %v823_v25 = vmax.f32 %v821_v1, %v822_v59  ;;  %v814_v26 = vmax.f32 %v607_v58, %v688_v19  ;;  %v798_v29 = vrot.slane %v797_v13, 1 }
 0x150   :  { %v808_v61 = vrot.slane %v807_v16, 4  ;;  %v985_v32 = vunpack.c.l.b16 %v882_v24  ;;  %v612_v40 = vmax.f32 %v461_v22, 0.0  ;;  %v565_v0 = vadd.f32 %v1848_v6, %v1750_v14 }
 0x151   :  { %v1021_v31 = vsel %vm1003_vm8, %v987_v20, %v1020_v37  ;;  %v824_v34 = vrot.slane %v823_v25, 2  ;;  %v815_v35 = vrot.slane %v814_v26, 4  ;;  %v799_v36 = vmax.f32 %v797_v13, %v798_v29 }
 0x152   :  { %v809_v38 = vmax.f32 %v807_v16, %v808_v61  ;;  %v1004_v41 = vsel %vm1003_vm8, %v985_v32, %v1002_v51  ;;  %v465_v46 = vadd.f32 %v1853_v11, %v1752_v15  ;;  %v617_v37 = vmax.f32 %v565_v0, 0.0 }
 0x153   :  { %v825_v21 = vmax.f32 %v823_v25, %v824_v34  ;;  %v816_v44 = vmax.f32 %v814_v26, %v815_v35  ;;  %v883_v49 = vpack.c.bf16 %v799_v36, %v799_v36  ;;  %v467_v50 = vadd.f32 %v1855_v23, %v1754_v17 }
 0x154   :  { %v810_v47 = vrot.slane %v809_v38, 2  ;;  %v613_v28 = vmax.f32 %v463_v12, 0.0  ;;  %v615_v57 = vmax.f32 %v465_v46, 0.0  ;;  %v695_v6 = vsel %vm641_vm2, %v617_v37, 0.0 }
 0x155   :  { %v826_v27 = vrot.slane %v825_v21, 1  ;;  %v817_v53 = vrot.slane %v816_v44, 2  ;;  %v616_v51 = vmax.f32 %v467_v50, 0.0  ;;  %v570_v60 = vadd.f32 %v1866_v42, %v1750_v14 }
 0x156   :  { %v811_v58 = vmax.f32 %v809_v38, %v810_v47  ;;  %v842_v52 = vmax.f32 %v614_v30, %v695_v6  ;;  %v693_v43 = vsel %vm639_vm3, %v615_v57, 0.0  ;;  %v986_v63 = vunpack.c.l.b16 %v883_v49 }
 0x157   :  { %v827_v54 = vmax.f32 %v825_v21, %v826_v27  ;;  %v818_v11 = vmax.f32 %v816_v44, %v817_v53  ;;  %v828_v1 = vmax.f32 %v612_v40, %v693_v43  ;;  %v694_v2 = vsel %vm640_vm4, %v616_v51, 0.0 }
 0x158   :  { %v812_v23 = vrot.slane %v811_v58, 1  ;;  %v843_v8 = vrot.slane %v842_v52, 4  ;;  %v835_v9 = vmax.f32 %v613_v28, %v694_v2  ;;  %v620_v39 = vmax.f32 %v570_v60, 0.0 }
 0x159   :  { %v887_v4 = vpack.c.bf16 %v827_v54, %v827_v54  ;;  %v819_v5 = vrot.slane %v818_v11, 1  ;;  %v829_v59 = vrot.slane %v828_v1, 4  ;;  %v471_v42 = vadd.f32 %v1868_v48, %v1752_v15 }
 0x15a   :  { %v813_v10 = vmax.f32 %v811_v58, %v812_v23  ;;  %v844_v19 = vmax.f32 %v842_v52, %v843_v8  ;;  %v836_v22 = vrot.slane %v835_v9, 4  ;;  %v473_v26 = vadd.f32 %v1873_v45, %v1754_v17 }
 0x15b   :  { %v990_v13 = vunpack.c.l.b16 %v887_v4  ;;  %v820_v16 = vmax.f32 %v818_v11, %v819_v5  ;;  %v830_v24 = vmax.f32 %v828_v1, %v829_v59  ;;  %v618_v25 = vmax.f32 %v471_v42, 0.0 }
 0x15c   :  { %v885_v20 = vpack.c.bf16 %v813_v10, %v813_v10  ;;  %v845_v30 = vrot.slane %v844_v19, 2  ;;  %v837_v12 = vmax.f32 %v835_v9, %v836_v22  ;;  %v573_v48 = vadd.f32 %v1875_v55, %v1750_v14 }
 0x15d   :  { %v1022_v29 = vsel %vm1005_vm9, %v990_v13, %v1021_v31  ;;  %v886_v61 = vpack.c.bf16 %v820_v16, %v820_v16  ;;  %v831_v34 = vrot.slane %v830_v24, 2  ;;  %v475_v35 = vadd.f32 %v1881_v62, %v1752_v15 }
 0x15e   :  { %v988_v32 = vunpack.c.l.b16 %v885_v20  ;;  %v846_v38 = vmax.f32 %v844_v19, %v845_v30  ;;  %v838_v40 = vrot.slane %v837_v12, 2  ;;  %v477_v0 = vadd.f32 %v1883_v33, %v1754_v17 }
 0x15f   :  { %v989_v36 = vunpack.c.l.b16 %v886_v61  ;;  %v832_v31 = vmax.f32 %v830_v24, %v831_v34  ;;  %v623_v21 = vmax.f32 %v573_v48, 0.0  ;;  %v621_v44 = vmax.f32 %v475_v35, 0.0 }
 0x160   :  { %v1006_v45 = vsel %vm1005_vm9, %v988_v32, %v1004_v41  ;;  %v847_v46 = vrot.slane %v846_v38, 1  ;;  %v839_v49 = vmax.f32 %v837_v12, %v838_v40  ;;  %v622_v47 = vmax.f32 %v477_v0, 0.0 }
 0x161   :  { %v1012_v14 = vsel %vm999_vm6, %v1850_v7, %v1809_v56  ;;  %v833_v55 = vrot.slane %v832_v31, 1  ;;  %v701_v15 = vsel %vm641_vm2, %v623_v21, 0.0  ;;  %v699_v62 = vsel %vm639_vm3, %v621_v44, 0.0  ;;  %v1333_v44 = vld [vmem:[%s1960_s4] ss:$0 sm:$0xff] }
 0x162   :  { %v1013_v17 = vsel %vm1001_vm7, %v1885_v3, %v1012_v14  ;;  %v848_v33 = vmax.f32 %v846_v38, %v847_v46  ;;  %v840_v41 = vrot.slane %v839_v49, 1  ;;  %v863_v37 = vmax.f32 %v620_v39, %v701_v15 }
 0x163   :  { %v849_v50 = vmax.f32 %v618_v25, %v699_v62  ;;  %v834_v27 = vmax.f32 %v832_v31, %v833_v55  ;;  %v619_v53 = vmax.f32 %v473_v26, 0.0  ;;  %v700_v28 = vsel %vm640_vm4, %v622_v47, 0.0 }
 0x164   :  { %v1014_v56 = vsel %vm1003_vm8, %v986_v63, %v1013_v17  ;;  %v890_v7 = vpack.c.bf16 %v848_v33, %v848_v33  ;;  %v841_v57 = vmax.f32 %v839_v49, %v840_v41  ;;  %v864_v58 = vrot.slane %v863_v37, 4 }
 0x165   :  { %v850_v6 = vrot.slane %v849_v50, 4  ;;  %v888_v51 = vpack.c.bf16 %v834_v27, %v834_v27  ;;  %v856_v60 = vmax.f32 %v619_v53, %v700_v28  ;;  %v1015_v3 = vsel %vm1005_vm9, %v989_v36, %v1014_v56 }
 0x166   :  { %v993_v54 = vunpack.c.l.b16 %v890_v7  ;;  %v889_v11 = vpack.c.bf16 %v841_v57, %v841_v57  ;;  %v865_v52 = vmax.f32 %v863_v37, %v864_v58 }
 0x167   :  { %v851_v43 = vmax.f32 %v849_v50, %v850_v6  ;;  %v991_v23 = vunpack.c.l.b16 %v888_v51  ;;  %v857_v1 = vrot.slane %v856_v60, 4 }
 0x168   :  { %v866_v2 = vrot.slane %v865_v52, 2  ;;  %v1023_v4 = vsel %vm1007_vm10, %v993_v54, %v1022_v29  ;;  %v992_v63 = vunpack.c.l.b16 %v889_v11 }
 0x169   :  { %v852_v18 = vrot.slane %v851_v43, 2  ;;  %v858_v5 = vmax.f32 %v856_v60, %v857_v1  ;;  %v1008_v8 = vsel %vm1007_vm10, %v991_v23, %v1006_v45 }
 0x16a   :  { %v867_v9 = vmax.f32 %v865_v52, %v866_v2  ;;  %v1016_v59 = vsel %vm1007_vm10, %v992_v63, %v1015_v3 }
 0x16b   :  { %v853_v10 = vmax.f32 %v851_v43, %v852_v18  ;;  %v859_v39 = vrot.slane %v858_v5, 2 }
 0x16c   :  { %v868_v42 = vrot.slane %v867_v9, 1 }
 0x16d   :  { %v854_v13 = vrot.slane %v853_v10, 1  ;;  %v860_v16 = vmax.f32 %v858_v5, %v859_v39 }
 0x16e   :  { %v869_v19 = vmax.f32 %v867_v9, %v868_v42 }
 0x16f   :  { %v855_v22 = vmax.f32 %v853_v10, %v854_v13  ;;  %v861_v20 = vrot.slane %v860_v16, 1 }
 0x170   :  { %v893_v24 = vpack.c.bf16 %v869_v19, %v869_v19 }
 0x171   :  { %v891_v25 = vpack.c.bf16 %v855_v22, %v855_v22  ;;  %v862_v26 = vmax.f32 %v860_v16, %v861_v20 }
 0x172   :  { %v996_v29 = vunpack.c.l.b16 %v893_v24 }
 0x173   :  { %v994_v61 = vunpack.c.l.b16 %v891_v25  ;;  %v892_v30 = vpack.c.bf16 %v862_v26, %v862_v26 }
 0x174   :  { %v1024_v12 = vsel %vm1009_vm11, %v996_v29, %v1023_v4 }
 0x175   :  { %v1010_v32 = vsel %vm1009_vm11, %v994_v61, %v1008_v8  ;;  %v1027_v34 = vpack.c.b16 %v1024_v12, %v1024_v12  ;;  %v995_v48 = vunpack.c.l.b16 %v892_v30 }
 0x176   :  { %v1025_v38 = vpack.c.b16 %v1010_v32, %v1010_v32 }
 0x177   :  { %1406 = vmatmul.mubr.bf16.vlgmr.msra.gmra.mrb[32].mxu1 %v1027_v34  ;;  %v1017_v35 = vsel %vm1009_vm11, %v995_v48, %v1016_v59 }
 0x178   :  { %v1026_v36 = vpack.c.b16 %v1017_v35, %v1017_v35 }
 0x17a   :  { %1207 = vmatprep.mubr.bf16.mxu0 %v1026_v36 }
 0x17b   :  { %1208 = vmatmul.mubr.bf16.vlgmr.msra.gmra.mrb[32].mxu0 %v1025_v38 }
 0x24a   :  { %v1249_v40 = vpop.f32.mrb[32].mxu1 }
 0x24b   :  { %v1407_v0 = vpop.f32.mrb[33].mxu1 }
 0x24c   :  { %v1252_v45 = vpop.f32.mrb[34].mxu1 }
 0x24d   :  { %v1408_v31 = vpop.f32.mrb[35].mxu1 }
 0x24e   :  { %v1374_v21 = vpop.f32.mrb[32].mxu0 }
 0x24f   :  { %v1375_v46 = vpop.f32.mrb[33].mxu0 }
 0x250   :  { %v1376_v49 = vadd.f32 %v1375_v46, %v1374_v21  ;;  %v1377_v47 = vpop.f32.mrb[34].mxu0 }
 0x251   :  { %v1378_v14 = vpop.f32.mrb[35].mxu0 }
 0x252   :  { %v1210_v55 = vadd.f32 %v1376_v49, %v1333_v44 }
 0x254   :  { %v1250_v15 = vadd.f32 %v1249_v40, %v1210_v55 }
 0x256   :  { %1255 = vst [vmem:[#allocation5] sm:$0xff] %v1250_v15 }
 0x257   :  { %1537 = shalt.err (!%p1534_p12)
}
 0x258   :  { %s1538_s4 = scalar_lea.hbm %s1961_s5, 128 }
 0x259   :  { %p1539_p13 = scmp.ne.s32.totalorder %s1961_s5, %s1538_s4  ;;  %p1542_p0 = scmp.lt.u32.totalorder %s1538_s4, %s1961_s5 }
 0x25b   :  { %p1544_p1 = pnand %p1542_p0, %p1539_p13 }
 0x25d   :  { %1547 = shalt.err (!%p1544_p1)
}
 0x25e   :  { %1265 = dma.vmem_to_hbm [thread:$0]  %s1263_s9, 128, %s1961_s5, [#allocation4]  }
 0x25f   :  { %1550 = dma.done.wait [#allocation4], 128  }
 0x260   :  { %1551 = vsyncadd [#allocation4], 4294967168 }
 0x261   :  { %1269 = vsyncpa [#allocation3], 1 }
 0x262   :  { %1270 = vsyncpa [#allocation4], 1 }

</bundles_post_ra>
